<compile_context>
chip_gen: v7x
topology: tpu7x:2x2x1
jax: 0.10.0
libtpu: 0.0.40
codegen_flags: <defaults>
</compile_context>

<pallas_src>
import functools

import jax
import jax.numpy as jnp
from jax.experimental import pallas as pl
from jax.experimental.pallas import tpu as pltpu


def ngcf_kernel(cnt_ref, ids_ref, adj_ref, x_src_ref, x_dst_ref, w_ref, b_ref,
                out_ref, agg_ref, *, in_pad, tile_src, src_resident):
    i = pl.program_id(0)
    k = pl.program_id(1)

    @pl.when(k == 0)
    def _init():
        agg_ref[...] = jnp.zeros_like(agg_ref)

    # Neighbor aggregation on the MXU: agg[v] += sum_u norm(u,v) * x_src[u].
    # Only non-empty adjacency blocks are scheduled; padded schedule entries
    # (k >= cnt) repeat the previous block and must be skipped here.
    @pl.when(k < cnt_ref[i])
    def _accumulate():
        if src_resident:
            kb = ids_ref[i, k]
            start = pl.multiple_of(kb * tile_src, tile_src)
            x_src = x_src_ref[pl.ds(start, tile_src), :]
        else:
            x_src = x_src_ref[...]
        agg_ref[...] += jnp.dot(adj_ref[...], x_src,
                                preferred_element_type=jnp.float32)

    @pl.when(k == pl.num_programs(1) - 1)
    def _epilogue():
        agg = agg_ref[...]                       # (tile_dst, in_pad) f32
        x_dst = x_dst_ref[...]                   # (tile_dst, in_pad) f32
        w1_t = w_ref[:in_pad, :]                 # static, sublane-aligned slices of [W1^T; W2^T]
        w2_t = w_ref[in_pad:, :]
        h = jnp.dot(x_dst + agg, w1_t, preferred_element_type=jnp.float32)
        h = h + jnp.dot(agg * x_dst, w2_t, preferred_element_type=jnp.float32)
        h = h + b_ref[...]                       # b1 + b2 (each applied once in _our4)
        h = jnp.where(h >= 0.0, h, 0.2 * h)      # LeakyReLU(0.2)
        # TODO(synk): nn.Dropout treated as eval-mode identity (training parity would need
        # pltpu.prng_seed/prng_random_bits masking here).
        # F.normalize(p=2, dim=1): x / max(||x||_2, 1e-12), via the EUP rsqrt path.
        sumsq = jnp.sum(h * h, axis=1, keepdims=True)
        inv = jax.lax.rsqrt(jnp.maximum(sumsq, 1e-24))
        out_ref[...] = (h * inv).astype(out_ref.dtype)


def _round_up(x, m):
    return ((x + m - 1) // m) * m


def _pad2(x, rows, cols):
    return jnp.pad(x, ((0, rows - x.shape[0]), (0, cols - x.shape[1])))


def ngcf_dst_update(adj_norm, x_src, x_dst, w1, b1, w2, b2, *,
                    tile_dst=512, tile_src=2048, src_resident=None,
                    out_dtype=jnp.float32):
    """Updated features for one destination node type of NGCFLayer_our4.

    adj_norm : (n_dst, n_src) dense per-edge norms (0 for non-edges)
    x_src    : (n_src, in)    source-type features
    x_dst    : (n_dst, in)    destination-type features
    w1, w2   : (out, in)      PyTorch Linear weights;  b1, b2 : (out,) biases

    Must be called eagerly (the block-sparsity schedule size depends on the graph).
    """
    n_dst, n_src = adj_norm.shape
    in_size = x_src.shape[1]
    out_size = w1.shape[0]
    in_pad = _round_up(in_size, 8)   # sublane alignment for static weight slices (not 128!)

    # --- tile selection --------------------------------------------------------------
    # Choose the number of tiles first (minimal padding), and keep at least two dst-row
    # tiles so the "parallel" axis can shard across the two v7x TensorCores.
    n_row = pl.cdiv(n_dst, tile_dst)
    if n_row == 1 and n_dst > 8:
        n_row = 2
    tile_dst = _round_up(pl.cdiv(n_dst, n_row), 8)
    n_dst_p = tile_dst * n_row

    n_col = pl.cdiv(n_src, tile_src)
    tile_src = _round_up(pl.cdiv(n_src, n_col), 128)
    n_src_p = tile_src * n_col

    # --- operand preparation ----------------------------------------------------------
    # Adjacency / x_src (the HBM-dominant streams) travel as bf16; accumulation stays f32.
    # NOTE: this rounds the 1/sqrt(deg) edge norms to bf16 (inference-grade accuracy).
    adj_p = _pad2(adj_norm, n_dst_p, n_src_p).astype(jnp.bfloat16)
    x_src_p = _pad2(x_src, n_src_p, in_pad).astype(jnp.bfloat16)
    x_dst_p = _pad2(x_dst, n_dst_p, in_pad).astype(jnp.float32)

    # Stacked [W1^T; W2^T]; each half zero-padded to in_pad rows so the in-kernel static
    # slice never crosses an (8,128) tile boundary.  Bias pre-summed (b1 + b2).
    w1t = jnp.zeros((in_pad, out_size), jnp.float32).at[:in_size, :].set(w1.T.astype(jnp.float32))
    w2t = jnp.zeros((in_pad, out_size), jnp.float32).at[:in_size, :].set(w2.T.astype(jnp.float32))
    w_stacked = jnp.concatenate([w1t, w2t], axis=0)
    b = (b1 + b2).reshape(1, out_size).astype(jnp.float32)

    # --- block-sparsity schedule (scalar-prefetched) ------------------------------------
    blk_nz = jnp.any(adj_p.reshape(n_row, tile_dst, n_col, tile_src) != 0, axis=(1, 3))
    blk_cnt = jnp.sum(blk_nz, axis=1).astype(jnp.int32)            # non-empty blocks / row tile
    max_nblk = max(int(blk_cnt.max()), 1)
    order = jnp.argsort(jnp.logical_not(blk_nz).astype(jnp.int32), axis=1).astype(jnp.int32)
    ids = order[:, :max_nblk]                                      # non-empty block ids, ascending
    # Pad trailing schedule entries with the last valid id: consecutive identical block
    # indices make Pallas skip the (useless) re-DMA; the k < cnt gate skips the compute.
    pos = jnp.arange(max_nblk, dtype=jnp.int32)[None, :]
    last = jnp.take_along_axis(ids, jnp.maximum(blk_cnt - 1, 0)[:, None], axis=1)
    blk_ids = jnp.where(pos < blk_cnt[:, None], ids, last)
    # TODO(synk): for huge graphs the dense padded adjacency still occupies HBM; a compacted
    # block-CSR storage would also shrink HBM footprint (only the schedule changes).

    # --- VMEM budgeting -----------------------------------------------------------------
    lane_in = _round_up(in_pad, 128)
    lane_out = _round_up(out_size, 128)
    if src_resident is None:
        # Keep x_src fully VMEM-resident (no per-row-tile refetch) while one copy stays
        # under ~2 MiB (lane-padded); otherwise stream the selected src block per step.
        src_resident = n_src_p * lane_in * 2 <= (2 << 20)
    footprint = (
        2 * tile_dst * tile_src * 2                                   # adjacency (bf16, 2 bufs)
        + 2 * (n_src_p if src_resident else tile_src) * lane_in * 2   # x_src (bf16)
        + 2 * tile_dst * lane_in * 4                                  # x_dst (f32)
        + 2 * 2 * in_pad * lane_out * 4                               # stacked weights
        + 2 * tile_dst * lane_out * 4                                 # output tile
        + tile_dst * lane_in * 4                                      # agg scratch
    )
    # Above v5e's 16 MiB scoped default, well under v7x's 64 MiB physical VMEM.
    vmem_limit = max(16 << 20, min(int(footprint * 1.5) + (4 << 20), 48 << 20))

    # --- specs ----------------------------------------------------------------------------
    adj_spec = pl.BlockSpec((tile_dst, tile_src),
                            lambda i, k, cnt, ids_r: (i, ids_r[i, k]))
    if src_resident:
        x_src_spec = pl.BlockSpec((n_src_p, in_pad), lambda i, k, cnt, ids_r: (0, 0))
    else:
        x_src_spec = pl.BlockSpec((tile_src, in_pad), lambda i, k, cnt, ids_r: (ids_r[i, k], 0))

    kernel = functools.partial(ngcf_kernel, in_pad=in_pad, tile_src=tile_src,
                               src_resident=src_resident)

    out = pl.pallas_call(
        kernel,
        out_shape=jax.ShapeDtypeStruct((n_dst_p, out_size), out_dtype),
        grid_spec=pltpu.PrefetchScalarGridSpec(
            num_scalar_prefetch=2,
            grid=(n_row, max_nblk),
            in_specs=[
                adj_spec,                                                          # adjacency norms (bf16)
                x_src_spec,                                                        # source features (bf16)
                pl.BlockSpec((tile_dst, in_pad), lambda i, k, cnt, ids_r: (i, 0)),  # dst features (f32)
                pl.BlockSpec((2 * in_pad, out_size), lambda i, k, cnt, ids_r: (0, 0)),  # [W1^T; W2^T]
                pl.BlockSpec((1, out_size), lambda i, k, cnt, ids_r: (0, 0)),      # b1 + b2
            ],
            out_specs=pl.BlockSpec((tile_dst, out_size), lambda i, k, cnt, ids_r: (i, 0)),
            scratch_shapes=[pltpu.VMEM((tile_dst, in_pad), jnp.float32)],          # agg accumulator
        ),
        compiler_params=pltpu.CompilerParams(
            dimension_semantics=("parallel", "arbitrary"),
            vmem_limit_bytes=vmem_limit,
        ),
    )(blk_cnt, blk_ids, adj_p, x_src_p, x_dst_p, w_stacked, b)
    return out[:n_dst]


def ngcf_layer_forward(feat_user, feat_item, norm_ui, w1, b1, w2, b2, **kw):
    """Full NGCFLayer_our4.forward: returns {'user': h_user, 'item': h_item}."""
    h_user = ngcf_dst_update(norm_ui, feat_item, feat_user, w1, b1, w2, b2, **kw)
    h_item = ngcf_dst_update(norm_ui.T, feat_user, feat_item, w1, b1, w2, b2, **kw)
    return {"user": h_user, "item": h_item}


def reference(adj_norm, x_src, x_dst, w1, b1, w2, b2):
    # Mirrors the PyTorch layer; applies the same bf16 rounding of adjacency / x_src
    # that the kernel uses for its HBM streams.
    adj = adj_norm.astype(jnp.bfloat16).astype(jnp.float32)
    xs = x_src.astype(jnp.bfloat16).astype(jnp.float32)
    agg = jnp.dot(adj, xs, precision="highest")
    h = (jnp.dot(x_dst + agg, w1.T, precision="highest")
         + jnp.dot(agg * x_dst, w2.T, precision="highest")
         + b1[None, :] + b2[None, :])
    h = jnp.where(h >= 0.0, h, 0.2 * h)
    nrm = jnp.sqrt(jnp.sum(h * h, axis=1, keepdims=True))
    return h / jnp.maximum(nrm, 1e-12)


if __name__ == "__main__":
    n_user, n_item = 256, 384
    in_size, out_size = 32, 32

    key = jax.random.PRNGKey(0)
    k_u, k_i, k_adj, k_w1, k_w2, k_b1, k_b2 = jax.random.split(key, 7)

    x_user = jax.random.normal(k_u, (n_user, in_size), dtype=jnp.float32)
    x_item = jax.random.normal(k_i, (n_item, in_size), dtype=jnp.float32)

    # Banded random bipartite graph → whole adjacency blocks are empty, exercising the
    # block-skipping (scalar-prefetch) path.  Standard NGCF norm_dict:
    #   norm_src[u] = 1/sqrt(deg_u), norm_dst[v] = 1/sqrt(deg_v), edge norm = product.
    u_pos = jnp.arange(n_user, dtype=jnp.float32)[:, None] * (n_item / n_user)
    i_pos = jnp.arange(n_item, dtype=jnp.float32)[None, :]
    band = jnp.abs(u_pos - i_pos) < 48.0
    rnd = jax.random.bernoulli(k_adj, 0.2, (n_user, n_item))
    mask = (band & rnd).astype(jnp.float32)
    deg_u = jnp.maximum(mask.sum(axis=1, keepdims=True), 1.0)   # (n_user, 1)
    deg_i = jnp.maximum(mask.sum(axis=0, keepdims=True), 1.0)   # (1, n_item)
    norm_ui = mask / jnp.sqrt(deg_u * deg_i)                    # (n_user, n_item)

    # Xavier-uniform weights (PyTorch layout (out, in)); small random biases to exercise
    # the bias path (module init sets them to zero, but forward must handle any value).
    bound = (6.0 / (in_size + out_size)) ** 0.5
    w1 = jax.random.uniform(k_w1, (out_size, in_size), jnp.float32, -bound, bound)
    w2 = jax.random.uniform(k_w2, (out_size, in_size), jnp.float32, -bound, bound)
    b1 = 0.05 * jax.random.normal(k_b1, (out_size,), jnp.float32)
    b2 = 0.05 * jax.random.normal(k_b2, (out_size,), jnp.float32)

    # (a) production-default tiles (auto-clamped; x_src VMEM-resident path)
    out_a = ngcf_layer_forward(x_user, x_item, norm_ui, w1, b1, w2, b2)
    # (b) small explicit tiles + forced streaming x_src → exercises the multi-tile grid,
    #     block skipping, and the data-dependent (non-resident) x_src path
    out_b = ngcf_layer_forward(x_user, x_item, norm_ui, w1, b1, w2, b2,
                               tile_dst=128, tile_src=128, src_resident=False)
    jax.block_until_ready((out_a, out_b))

    ref_user = reference(norm_ui, x_item, x_user, w1, b1, w2, b2)
    ref_item = reference(norm_ui.T, x_user, x_item, w1, b1, w2, b2)

    for name, got, ref in [("user_a", out_a["user"], ref_user),
                           ("item_a", out_a["item"], ref_item),
                           ("user_b", out_b["user"], ref_user),
                           ("item_b", out_b["item"], ref_item)]:
        err = float(jnp.max(jnp.abs(got - ref)))
        assert err < 3e-4, (name, err)

    print("KERNEL_OK")
</pallas_src>

<mosaic_0001>
module attributes {stable_mosaic.version = 11 : i64} {
  func.func @ngcf_kernel(%arg0: i32, %arg1: i32, %arg2: memref<2xi32, #tpu.memory_space<smem>>, %arg3: memref<2x1xi32, #tpu.memory_space<smem>>, %arg4: memref<128x384xbf16, #tpu.memory_space<vmem>>, %arg5: memref<384x32xbf16, #tpu.memory_space<vmem>>, %arg6: memref<128x32xf32, #tpu.memory_space<vmem>>, %arg7: memref<64x32xf32, #tpu.memory_space<vmem>>, %arg8: memref<1x32xf32, #tpu.memory_space<vmem>>, %arg9: memref<128x32xf32, #tpu.memory_space<vmem>>, %arg10: memref<128x32xf32, #tpu.memory_space<vmem>>) attributes {dimension_semantics = [#tpu.dimension_semantics<parallel>, #tpu.dimension_semantics<arbitrary>], iteration_bounds = array<i64: 2, 1>, scalar_prefetch = 2 : i64, scratch_operands = 1 : i64, tpu.core_type = #tpu.core_type<tc>, window_params = [{transform_indices = @transform_0, window_bounds = array<i64: 128, 384>}, {pipeline_mode = #tpu.pipeline_mode<synchronous>, transform_indices = @transform_1, window_bounds = array<i64: 384, 32>}, {transform_indices = @transform_2, window_bounds = array<i64: 128, 32>}, {pipeline_mode = #tpu.pipeline_mode<synchronous>, transform_indices = @transform_3, window_bounds = array<i64: 64, 32>}, {pipeline_mode = #tpu.pipeline_mode<synchronous>, transform_indices = @transform_4, window_bounds = array<i64: 1, 32>}, {transform_indices = @transform_5, window_bounds = array<i64: 128, 32>}]} {
    %c0_i32 = arith.constant 0 : i32
    %0 = arith.cmpi eq, %arg1, %c0_i32 : i32
    %1 = arith.extui %0 : i1 to i32
    %c0_i32_0 = arith.constant 0 : i32
    %2 = arith.cmpi ne, %1, %c0_i32_0 : i32
    scf.if %2 {
      %cst = arith.constant 0.000000e+00 : f32
      %11 = vector.broadcast %cst : f32 to vector<128x32xf32>
      %c0 = arith.constant 0 : index
      %c0_4 = arith.constant 0 : index
      %12 = vector.load %arg10[%c0, %c0_4] : memref<128x32xf32, #tpu.memory_space<vmem>>, vector<128x32xf32>
      tpu.vector_store %arg10[%c0, %c0_4], %11 {strides = array<i32>} : memref<128x32xf32, #tpu.memory_space<vmem>>, vector<128x32xf32>,
    } else {
    }
    %3 = arith.index_cast %arg0 : i32 to index
    %4 = memref.load %arg2[%3] : memref<2xi32, #tpu.memory_space<smem>>
    %5 = arith.cmpi slt, %arg1, %4 : i32
    %6 = arith.extui %5 : i1 to i32
    %c0_i32_1 = arith.constant 0 : i32
    %7 = arith.cmpi ne, %6, %c0_i32_1 : i32
    scf.if %7 {
      %11 = arith.index_cast %arg0 : i32 to index
      %12 = arith.index_cast %arg1 : i32 to index
      %13 = memref.load %arg3[%11, %12] : memref<2x1xi32, #tpu.memory_space<smem>>
      %c384_i32 = arith.constant 384 : i32
      %14 = arith.muli %13, %c384_i32 : i32
      %15 = tpu.assume_multiple %14, 384 : i32
      %16 = arith.index_cast %15 : i32 to index
      %c0 = arith.constant 0 : index
      %17 = vector.load %arg5[%16, %c0] : memref<384x32xbf16, #tpu.memory_space<vmem>>, vector<384x32xbf16>
      %c0_4 = arith.constant 0 : index
      %c0_5 = arith.constant 0 : index
      %18 = vector.load %arg10[%c0_4, %c0_5] : memref<128x32xf32, #tpu.memory_space<vmem>>, vector<128x32xf32>
      %c0_6 = arith.constant 0 : index
      %c0_7 = arith.constant 0 : index
      %19 = vector.load %arg4[%c0_6, %c0_7] : memref<128x384xbf16, #tpu.memory_space<vmem>>, vector<128x384xbf16>
      %cst = arith.constant dense<0.000000e+00> : vector<128x32xf32>
      %20 = tpu.matmul %19, %17, %cst {dimension_numbers = #tpu.dot_dimension_numbers<[1], [0], [0], [1], [0, 0, 1, 1], [], []>} : vector<128x384xbf16>, vector<384x32xbf16>, vector<128x32xf32> -> vector<128x32xf32>
      %21 = arith.addf %18, %20 : vector<128x32xf32>
      %c0_8 = arith.constant 0 : index
      %c0_9 = arith.constant 0 : index
      %22 = vector.load %arg10[%c0_8, %c0_9] : memref<128x32xf32, #tpu.memory_space<vmem>>, vector<128x32xf32>
      tpu.vector_store %arg10[%c0_8, %c0_9], %21 {strides = array<i32>} : memref<128x32xf32, #tpu.memory_space<vmem>>, vector<128x32xf32>,
    } else {
    }
    %c0_i32_2 = arith.constant 0 : i32
    %8 = arith.cmpi eq, %arg1, %c0_i32_2 : i32
    %9 = arith.extui %8 : i1 to i32
    %c0_i32_3 = arith.constant 0 : i32
    %10 = arith.cmpi ne, %9, %c0_i32_3 : i32
    scf.if %10 {
      %c0 = arith.constant 0 : index
      %c0_4 = arith.constant 0 : index
      %11 = vector.load %arg10[%c0, %c0_4] : memref<128x32xf32, #tpu.memory_space<vmem>>, vector<128x32xf32>
      %c0_5 = arith.constant 0 : index
      %c0_6 = arith.constant 0 : index
      %12 = vector.load %arg6[%c0_5, %c0_6] : memref<128x32xf32, #tpu.memory_space<vmem>>, vector<128x32xf32>
      %c0_7 = arith.constant 0 : index
      %c0_8 = arith.constant 0 : index
      %13 = vector.load %arg7[%c0_7, %c0_8] : memref<64x32xf32, #tpu.memory_space<vmem>>, vector<32x32xf32>
      %c32 = arith.constant 32 : index
      %c0_9 = arith.constant 0 : index
      %14 = vector.load %arg7[%c32, %c0_9] : memref<64x32xf32, #tpu.memory_space<vmem>>, vector<32x32xf32>
      %15 = arith.addf %12, %11 : vector<128x32xf32>
      %cst = arith.constant dense<0.000000e+00> : vector<128x32xf32>
      %16 = tpu.matmul %15, %13, %cst {dimension_numbers = #tpu.dot_dimension_numbers<[1], [0], [0], [1], [0, 0, 1, 1], [], []>} : vector<128x32xf32>, vector<32x32xf32>, vector<128x32xf32> -> vector<128x32xf32>
      %17 = arith.mulf %11, %12 : vector<128x32xf32>
      %cst_10 = arith.constant dense<0.000000e+00> : vector<128x32xf32>
      %18 = tpu.matmul %17, %14, %cst_10 {dimension_numbers = #tpu.dot_dimension_numbers<[1], [0], [0], [1], [0, 0, 1, 1], [], []>} : vector<128x32xf32>, vector<32x32xf32>, vector<128x32xf32> -> vector<128x32xf32>
      %19 = arith.addf %16, %18 : vector<128x32xf32>
      %c0_11 = arith.constant 0 : index
      %c0_12 = arith.constant 0 : index
      %20 = vector.load %arg8[%c0_11, %c0_12] : memref<1x32xf32, #tpu.memory_space<vmem>>, vector<1x32xf32>
      %21 = vector.broadcast %20 : vector<1x32xf32> to vector<128x32xf32>
      %22 = arith.addf %19, %21 : vector<128x32xf32>
      %cst_13 = arith.constant 0.000000e+00 : f32
      %23 = vector.broadcast %cst_13 : f32 to vector<128x32xf32>
      %24 = arith.cmpf oge, %22, %23 : vector<128x32xf32>
      %cst_14 = arith.constant 2.000000e-01 : f32
      %25 = vector.broadcast %cst_14 : f32 to vector<128x32xf32>
      %26 = arith.mulf %25, %22 : vector<128x32xf32>
      %27 = arith.select %24, %22, %26 : vector<128x32xi1>, vector<128x32xf32>
      %28 = arith.mulf %27, %27 : vector<128x32xf32>
      %cst_15 = arith.constant dense<0.000000e+00> : vector<128xf32>
      %29 = vector.multi_reduction <add>, %28, %cst_15 [1] : vector<128x32xf32> to vector<128xf32>
      %30 = vector.shape_cast %29 : vector<128xf32> to vector<128x1xf32>
      %cst_16 = arith.constant 1.000000e-24 : f32
      %31 = vector.broadcast %cst_16 : f32 to vector<128x1xf32>
      %32 = arith.maximumf %30, %31 : vector<128x1xf32>
      %33 = math.rsqrt %32 : vector<128x1xf32>
      %34 = vector.broadcast %33 : vector<128x1xf32> to vector<128x32xf32>
      %35 = arith.mulf %27, %34 : vector<128x32xf32>
      %c0_17 = arith.constant 0 : index
      %c0_18 = arith.constant 0 : index
      %36 = vector.load %arg9[%c0_17, %c0_18] : memref<128x32xf32, #tpu.memory_space<vmem>>, vector<128x32xf32>
      tpu.vector_store %arg9[%c0_17, %c0_18], %35 {strides = array<i32>} : memref<128x32xf32, #tpu.memory_space<vmem>>, vector<128x32xf32>,
    } else {
    }
    return
  }
  func.func @transform_0(%arg0: i32, %arg1: i32, %arg2: memref<2xi32, #tpu.memory_space<smem>>, %arg3: memref<2x1xi32, #tpu.memory_space<smem>>) -> (i32, i32) {
    %0 = arith.index_cast %arg0 : i32 to index
    %1 = arith.index_cast %arg1 : i32 to index
    %2 = memref.load %arg3[%0, %1] : memref<2x1xi32, #tpu.memory_space<smem>>
    %c0_i32 = arith.constant 0 : i32
    return %arg0, %2 : i32, i32
  }
  func.func @transform_1(%arg0: i32, %arg1: i32, %arg2: memref<2xi32, #tpu.memory_space<smem>>, %arg3: memref<2x1xi32, #tpu.memory_space<smem>>) -> (i32, i32) {
    %c0_i32 = arith.constant 0 : i32
    %c0_i32_0 = arith.constant 0 : i32
    %c0_i32_1 = arith.constant 0 : i32
    return %c0_i32, %c0_i32_0 : i32, i32
  }
  func.func @transform_2(%arg0: i32, %arg1: i32, %arg2: memref<2xi32, #tpu.memory_space<smem>>, %arg3: memref<2x1xi32, #tpu.memory_space<smem>>) -> (i32, i32) {
    %c0_i32 = arith.constant 0 : i32
    %c0_i32_0 = arith.constant 0 : i32
    return %arg0, %c0_i32 : i32, i32
  }
  func.func @transform_3(%arg0: i32, %arg1: i32, %arg2: memref<2xi32, #tpu.memory_space<smem>>, %arg3: memref<2x1xi32, #tpu.memory_space<smem>>) -> (i32, i32) {
    %c0_i32 = arith.constant 0 : i32
    %c0_i32_0 = arith.constant 0 : i32
    %c0_i32_1 = arith.constant 0 : i32
    return %c0_i32, %c0_i32_0 : i32, i32
  }
  func.func @transform_4(%arg0: i32, %arg1: i32, %arg2: memref<2xi32, #tpu.memory_space<smem>>, %arg3: memref<2x1xi32, #tpu.memory_space<smem>>) -> (i32, i32) {
    %c0_i32 = arith.constant 0 : i32
    %c0_i32_0 = arith.constant 0 : i32
    %c0_i32_1 = arith.constant 0 : i32
    return %c0_i32, %c0_i32_0 : i32, i32
  }
  func.func @transform_5(%arg0: i32, %arg1: i32, %arg2: memref<2xi32, #tpu.memory_space<smem>>, %arg3: memref<2x1xi32, #tpu.memory_space<smem>>) -> (i32, i32) {
    %c0_i32 = arith.constant 0 : i32
    %c0_i32_0 = arith.constant 0 : i32
    return %arg0, %c0_i32 : i32, i32
  }
}

</mosaic_0001>

<bundles_post_ra>
// kernel: tpu_custom_call.1
= control target key start
LH: loop header
LB: loop body
LE: loop exit
PB: predicated region body
PF: predicated region fallthrough
CT: control target
= control target key end

     0   :  { %s2657_s0 = inlined_call_operand.vmem [shape: s32[2], index: 0, kind: input, shape index: {}]   ;;  %s2658_s2 = inlined_call_operand.vmem [shape: bf16[256,384], index: 2, kind: input, shape index: {}]   ;;  %s2659_s3 = inlined_call_operand.vmem [shape: bf16[384,32], index: 3, kind: input, shape index: {}]   ;;  %s2660_s4 = inlined_call_operand.vmem [shape: f32[256,32], index: 4, kind: input, shape index: {}]   ;;  %s2661_s5 = inlined_call_operand.vmem [shape: f32[64,32], index: 5, kind: input, shape index: {}]   ;;  %s2662_s6 = inlined_call_operand.vmem [shape: f32[1,32], index: 6, kind: input, shape index: {}]   ;;  %s2663_s7 = inlined_call_operand.vmem [shape: f32[256,32], index: 7, kind: output, shape index: {}]   ;;  %s2664_s1 = inlined_call_operand.vmem [shape: s32[2,1], index: 1, kind: input, shape index: {}]  }
   0x1   :  { %s12_s26 = sshll.u32 %s2657_s0, 4  ;;  %s16_s29 = sshll.u32 %s2664_s1, 4  ;;  %s13_s26 = int_to_ptr.vmem [resolvable:$true] %s12_s26  ;;  %s17_s29 = int_to_ptr.vmem [resolvable:$true] %s16_s29 }
   0x2   :  { %s2195_s30 = scalar_lea.vmem %s13_s26, 16  ;;  %p2200_p1 = scmp.lt.s32.totalorder %s13_s26, %s13_s26 }
   0x3   :  { %p2196_p0 = scmp.ne.s32.totalorder %s13_s26, %s2195_s30  ;;  %p2201_p2 = scmp.lt.s32.totalorder %s2195_s30, %s2195_s30 }
   0x5   :  { %p2202_p3 = por %p2201_p2, %p2200_p1 }
   0x7   :  { %p2203_p4 = pnand %p2202_p3, %p2196_p0 }
   0x9   :  { %2206 = shalt.err (!%p2203_p4)  }
   0xa   :  { %s2245_s8 = smov [#allocation4]   ;;  %s2207_s9 = scalar_lea.vmem %s17_s29, 32 }
   0xb   :  { %15 = dma.vmem_to_smem %s13_s26, 16, %s2245_s8, [#allocation3] }
   0xc   :  { %p2208_p5 = scmp.ne.s32.totalorder %s17_s29, %s2207_s9  ;;  %p2212_p6 = scmp.lt.s32.totalorder %s17_s29, %s17_s29 }
   0xd   :  { %p2213_p7 = scmp.lt.s32.totalorder %s2207_s9, %s2207_s9 }
   0xf   :  { %p2214_p8 = por %p2213_p7, %p2212_p6 }
  0x11   :  { %p2215_p9 = pnand %p2214_p8, %p2208_p5 }
  0x13   :  { %2218 = shalt.err (!%p2215_p9)  }
  0x14   :  { %s2246_s0 = smov [#allocation5]  }
  0x15   :  { %19 = dma.vmem_to_smem %s17_s29, 32, %s2246_s0, [#allocation3] }
  0x16   :  { %2231 = dma.done.wait [#allocation3], 48 }
  0x17   :  { %2232 = vsyncadd [#allocation3], 4294967248 }
  0x18   :  { %21 = sfence }
  0x19   :  { %s2294_s1 = smov 0   ;;  %s2296_s10 = smov 0  }
  0x1a   :  { %s2298_s11 = smov 0  }
  0x1b LB: > { %s39_s12 = sadd.s32 1, %s2239_s10  ;;  %p1736_p10 = scmp.ge.s32.totalorder %s2243_s11, 1  ;;  %s2243_s11 = sphi %s2298_s11, %s27_s11   ;;  %s2239_s10 = sphi %s2296_s10, %s2667_s10   ;;  %s2235_s1 = sphi %s2294_s1, %s2666_s1  }
  0x1c   : > { %p41_p11 = scmp.ge.s32.totalorder %s39_s12, 2  ;;  %p263_p12 = scmp.lt.s32.totalorder %s2243_s11, 3 }
  0x1e   : > { %s2669_s12 = smov (%p41_p11, %s39_s12), 0  ;;  %p264_p13 = pnand %p1736_p10, %p263_p12 }
  0x1f   : > { %s1737_s13 = sshll.u32 (!%p264_p13), %s2235_s1, 7  ;;  %s1738_s14 = sshll.u32 (!%p264_p13), %s2235_s1, 4  ;;  %vm354_vm0 = vcmask (!%p264_p13), 261120   ;;  %v2247_v0 = vmov (!%p264_p13), 0.0  }
  0x20   : > { %267 = sbr.rel (%p264_p13) target bundleno = 789 (0x315), region = 40  ;;  %s316_s15 = sld [smem:[#allocation5 + %s1737_s13]] (!%p264_p13)  ;;  %355 = vst.msk [vmem:[#allocation2] sm:$0xff] (!%p264_p13), %vm354_vm0, %v2247_v0  ;;  %356 = vst.msk [vmem:[#allocation2 + $0x8] sm:$0xff] (!%p264_p13), %vm354_vm0, %v2247_v0 }
  0x21   : > { %p2318_p0 = scmp.lt.s32.totalorder (!%p264_p13), %s1738_s14, 31  ;;  %357 = vst.msk [vmem:[#allocation2 + $0x10] sm:$0xff] (!%p264_p13), %vm354_vm0, %v2247_v0  ;;  %358 = vst.msk [vmem:[#allocation2 + $0x18] sm:$0xff] (!%p264_p13), %vm354_vm0, %v2247_v0  ;;  %s371_s17 = sld [smem:[#allocation4 + %s2235_s1]] (!%p264_p13) }
  0x22   : > { %359 = vst.msk [vmem:[#allocation2 + $0x20] sm:$0xff] (!%p264_p13), %vm354_vm0, %v2247_v0  ;;  %360 = vst.msk [vmem:[#allocation2 + $0x28] sm:$0xff] (!%p264_p13), %vm354_vm0, %v2247_v0 }
  0x23   : > { %361 = vst.msk [vmem:[#allocation2 + $0x30] sm:$0xff] (!%p264_p13), %vm354_vm0, %v2247_v0  ;;  %362 = vst.msk [vmem:[#allocation2 + $0x38] sm:$0xff] (!%p264_p13), %vm354_vm0, %v2247_v0 }
  0x24   : > { %363 = vst.msk [vmem:[#allocation2 + $0x40] sm:$0xff] (!%p264_p13), %vm354_vm0, %v2247_v0  ;;  %364 = vst.msk [vmem:[#allocation2 + $0x48] sm:$0xff] (!%p264_p13), %vm354_vm0, %v2247_v0 }
  0x25   : > { %365 = vst.msk [vmem:[#allocation2 + $0x50] sm:$0xff] (!%p264_p13), %vm354_vm0, %v2247_v0  ;;  %366 = vst.msk [vmem:[#allocation2 + $0x58] sm:$0xff] (!%p264_p13), %vm354_vm0, %v2247_v0 }
  0x26   : > { %367 = vst.msk [vmem:[#allocation2 + $0x60] sm:$0xff] (!%p264_p13), %vm354_vm0, %v2247_v0  ;;  %368 = vst.msk [vmem:[#allocation2 + $0x68] sm:$0xff] (!%p264_p13), %vm354_vm0, %v2247_v0  ;;  %s318_s25 = smul.u32 (!%p264_p13), 3, %s316_s15 }
  0x27   : > { %369 = vst.msk [vmem:[#allocation2 + $0x70] sm:$0xff] %vm354_vm0, %v2247_v0  ;;  %370 = vst.msk [vmem:[#allocation2 + $0x78] sm:$0xff] %vm354_vm0, %v2247_v0  ;;  %s2671_s14 = smov (!%p2318_p0, %s1738_s14), 31  ;;  %p1745_p2 = scmp.le.s32.totalorder %s371_s17, 0 }
  0x28   : > { %s1741_s18 = sshll.u32 %s2671_s14, 3  ;;  %p321_p1 = scmp.lt.s32.totalorder %s318_s25, 2  ;;  %v437_v55 = vld [vmem:[#allocation2] sm:$0xff] (!%p1745_p2)  ;;  %v438_v60 = vld [vmem:[#allocation2 + $0x8] sm:$0xff] (!%p1745_p2) }
  0x29   : > { %s2344_s21 = scalar_lea.vmem %s2660_s4, %s1741_s18  ;;  %s2349_s24 = scalar_lea.vmem %s2663_s7, %s1741_s18 }
  0x2a   : > { %s2079_s26 = smul.u32 3, %s2671_s14  ;;  %s2673_s25 = smov (!%p321_p1, %s318_s25), 2 }
  0x2b   : > { %375 = sbr.rel (%p1745_p2) target bundleno = 365 (0x16d), region = 48  ;;  %s383_s9 = sld [smem:[#allocation5 + %s1737_s13]] (!%p1745_p2) }
  0x2c   : > { %s324_s27 = sadd.s32 %s2079_s26, %s2673_s25 }
  0x2d   : > { %s1739_s28 = sshll.u32 %s324_s27, 2 }
  0x2e   : > { %s2354_s8 = scalar_lea.vmem %s2658_s2, %s1739_s28 }
  0x2f   : > { %v2133_v1 = vld [vmem:[%s2354_s8 + $0x4] ss:$12 sps:$4 sm:$0xff] (!%p1745_p2)   ;;  %v2134_v2 = vld [vmem:[%s2354_s8 + $0x8] ss:$12 sps:$4 sm:$0xff] (!%p1745_p2)   ;;  %v2131_v27 = vld [vmem:[%s2354_s8] ss:$12 sps:$4 sm:$0xff] (!%p1745_p2)  }
  0x30   : > { %789 = vmatprep.mubr.bf16.mxu0 (!%p1745_p2), %v2133_v1  ;;  %1967 = vmatprep.mubr.bf16.mxu1 (!%p1745_p2), %v2134_v2  ;;  %v2136_v28 = vld [vmem:[%s2354_s8 + $0x1c] ss:$12 sps:$4 sm:$0xff] (!%p1745_p2)   ;;  %v2135_v29 = vld [vmem:[%s2354_s8 + $0x20] ss:$12 sps:$4 sm:$0xff] (!%p1745_p2)   ;;  %v2142_v30 = vld [vmem:[%s2354_s8 + $0x38] ss:$12 sps:$4 sm:$0xff] (!%p1745_p2)  }
  0x31   : > { %s384_s0 = smul.u32 (!%p1745_p2), 384, %s383_s9  ;;  %v2138_v31 = vld [vmem:[%s2354_s8 + $0x18] ss:$12 sps:$4 sm:$0xff] (!%p1745_p2)   ;;  %v2139_v32 = vld [vmem:[%s2354_s8 + $0x34] ss:$12 sps:$4 sm:$0xff] (!%p1745_p2)  }
  0x32   : > { %v2143_v33 = vld [vmem:[%s2354_s8 + $0x50] ss:$12 sps:$4 sm:$0xff]   ;;  %v2150_v34 = vld [vmem:[%s2354_s8 + $0x68] ss:$12 sps:$4 sm:$0xff]   ;;  %v2144_v36 = vld [vmem:[%s2354_s8 + $0x4c] ss:$12 sps:$4 sm:$0xff]  }
  0x33   : > { %s385_s14 = sshra.s32 %s384_s0, 3  ;;  %v2141_v35 = vld [vmem:[%s2354_s8 + $0x30] ss:$12 sps:$4 sm:$0xff]   ;;  %v2151_v37 = vld [vmem:[%s2354_s8 + $0x80] ss:$12 sps:$4 sm:$0xff]  }
  0x34   : > { %s1747_s15 = sshll.u32 %s385_s14, 2  ;;  %v2158_v38 = vld [vmem:[%s2354_s8 + $0x98] ss:$12 sps:$4 sm:$0xff]   ;;  %v2146_v39 = vld [vmem:[%s2354_s8 + $0x48] ss:$12 sps:$4 sm:$0xff]  }
  0x35   : > { %s2363_s19 = scalar_lea.vmem %s2659_s3, %s1747_s15  ;;  %v2147_v40 = vld [vmem:[%s2354_s8 + $0x64] ss:$12 sps:$4 sm:$0xff]   ;;  %v2149_v42 = vld [vmem:[%s2354_s8 + $0x60] ss:$12 sps:$4 sm:$0xff]   ;;  %v2152_v43 = vld [vmem:[%s2354_s8 + $0x7c] ss:$12 sps:$4 sm:$0xff]  }
  0x36   : > { %v2107_v3 = vld [vmem:[%s2363_s19 + $0x40] sm:$0xff]   ;;  %v2110_v6 = vld [vmem:[%s2363_s19 + $0x48] sm:$0xff]   ;;  %v2113_v9 = vld [vmem:[%s2363_s19 + $0x50] sm:$0xff]  }
  0x37   : > { %v2108_v4 = vld [vmem:[%s2363_s19] sm:$0xff]   ;;  %1831 = vmatprep.subr.bf16.mxu0 %v2107_v3  ;;  %v2111_v7 = vld [vmem:[%s2363_s19 + $0x8] sm:$0xff]   ;;  %v2114_v10 = vld [vmem:[%s2363_s19 + $0x10] sm:$0xff]  }
  0x38   : > { %v2109_v5 = vld [vmem:[%s2363_s19 + $0x80] sm:$0xff]   ;;  %1832 = vmatpush3.bf16.msra.mxu0 %v2108_v4  ;;  %v2112_v8 = vld [vmem:[%s2363_s19 + $0x88] sm:$0xff]   ;;  %v2115_v11 = vld [vmem:[%s2363_s19 + $0x90] sm:$0xff]  }
  0x39   : > { %1951 = vmatprep.subr.bf16.mxu1 %v2109_v5  ;;  %1833 = vmatprep.subr.bf16.mxu0 %v2110_v6  ;;  %v2116_v12 = vld [vmem:[%s2363_s19 + $0x58] sm:$0xff]   ;;  %v2119_v15 = vld [vmem:[%s2363_s19 + $0x60] sm:$0xff]   ;;  %v2122_v18 = vld [vmem:[%s2363_s19 + $0x68] sm:$0xff]  }
  0x3a   : > { %1952 = vmatpush3.bf16.msra.mxu1 %v2109_v5  ;;  %v2117_v13 = vld [vmem:[%s2363_s19 + $0x18] sm:$0xff]   ;;  %v2121_v16 = vld [vmem:[%s2363_s19 + $0xa0] sm:$0xff]   ;;  %v2124_v19 = vld [vmem:[%s2363_s19 + $0xa8] sm:$0xff]  }
  0x3b   : > { %1953 = vmatprep.subr.bf16.mxu1 %v2112_v8  ;;  %v2118_v14 = vld [vmem:[%s2363_s19 + $0x98] sm:$0xff]   ;;  %v2120_v17 = vld [vmem:[%s2363_s19 + $0x20] sm:$0xff]   ;;  %v2123_v20 = vld [vmem:[%s2363_s19 + $0x28] sm:$0xff]  }
  0x3c   : > { %1834 = vmatpush3.bf16.msra.mxu0 %v2111_v7  ;;  %v2125_v21 = vld [vmem:[%s2363_s19 + $0x70] sm:$0xff]   ;;  %v2128_v24 = vld [vmem:[%s2363_s19 + $0x78] sm:$0xff]  }
  0x3d   : > { %1835 = vmatprep.subr.bf16.mxu0 %v2113_v9  ;;  %v2127_v22 = vld [vmem:[%s2363_s19 + $0xb0] sm:$0xff]   ;;  %v2130_v25 = vld [vmem:[%s2363_s19 + $0xb8] sm:$0xff]  }
  0x3e   : > { %1954 = vmatpush3.bf16.msra.mxu1 %v2112_v8  ;;  %v2126_v23 = vld [vmem:[%s2363_s19 + $0x30] sm:$0xff]   ;;  %v2129_v26 = vld [vmem:[%s2363_s19 + $0x38] sm:$0xff]  }
  0x3f   : > { %1955 = vmatprep.subr.bf16.mxu1 %v2115_v11  ;;  %v2159_v41 = vld [vmem:[%s2354_s8 + $0xb0] ss:$12 sps:$4 sm:$0xff]   ;;  %v2154_v44 = vld [vmem:[%s2354_s8 + $0x78] ss:$12 sps:$4 sm:$0xff]   ;;  %v2155_v45 = vld [vmem:[%s2354_s8 + $0x94] ss:$12 sps:$4 sm:$0xff]  }
  0x40   : > { %1836 = vmatpush3.bf16.msra.mxu0 %v2114_v10  ;;  %v2157_v46 = vld [vmem:[%s2354_s8 + $0x90] ss:$12 sps:$4 sm:$0xff]   ;;  %v2160_v47 = vld [vmem:[%s2354_s8 + $0xac] ss:$12 sps:$4 sm:$0xff]   ;;  %v2162_v48 = vld [vmem:[%s2354_s8 + $0xa8] ss:$12 sps:$4 sm:$0xff]  }
  0x41   : > { %1837 = vmatprep.subr.bf16.mxu0 %v2116_v12  ;;  %v439_v6 = vld [vmem:[#allocation2 + $0x10] sm:$0xff]  ;;  %v440_v12 = vld [vmem:[#allocation2 + $0x18] sm:$0xff] }
  0x42   : > { %1956 = vmatpush3.bf16.msra.mxu1 %v2115_v11 }
  0x43   : > { %1957 = vmatprep.subr.bf16.mxu1 %v2118_v14 }
  0x44   : > { %1838 = vmatpush3.bf16.msra.mxu0 %v2117_v13 }
  0x45   : > { %1839 = vmatprep.subr.bf16.mxu0 %v2119_v15 }
  0x46   : > { %1958 = vmatpush3.bf16.msra.mxu1 %v2118_v14 }
  0x47   : > { %1959 = vmatprep.subr.bf16.mxu1 %v2121_v16 }
  0x48   : > { %1840 = vmatpush3.bf16.msra.mxu0 %v2120_v17 }
  0x49   : > { %1841 = vmatprep.subr.bf16.mxu0 %v2122_v18 }
  0x4a   : > { %1960 = vmatpush3.bf16.msra.mxu1 %v2121_v16 }
  0x4b   : > { %1961 = vmatprep.subr.bf16.mxu1 %v2124_v19 }
  0x4c   : > { %1842 = vmatpush3.bf16.msra.mxu0 %v2123_v20 }
  0x4d   : > { %1843 = vmatprep.subr.bf16.mxu0 %v2125_v21 }
  0x4e   : > { %1962 = vmatpush3.bf16.msra.mxu1 %v2124_v19 }
  0x4f   : > { %1963 = vmatprep.subr.bf16.mxu1 %v2127_v22 }
  0x50   : > { %1844 = vmatpush3.bf16.msra.mxu0 %v2126_v23  ;;  %v441_v23 = vld [vmem:[#allocation2 + $0x20] sm:$0xff] }
  0x51   : > { %1845 = vmatprep.subr.bf16.mxu0 %v2128_v24 }
  0x52   : > { %1964 = vmatpush3.bf16.msra.mxu1 %v2127_v22 }
  0x53   : > { %1965 = vmatprep.subr.bf16.mxu1 %v2130_v25 }
  0x54   : > { %1846 = vmatpush3.bf16.msra.mxu0 %v2129_v26 }
  0x56   : > { %1966 = vmatpush3.bf16.msra.mxu1 %v2130_v25 }
  0x57   : > { %790 = vmatmul.mubr.bf16.vlgmr.msra.gmra.mrb[0].mxu0 %v2131_v27 }
  0x58   : > { %797 = vmatprep.mubr.bf16.mxu0 %v2136_v28  ;;  %v442_v28 = vld [vmem:[#allocation2 + $0x28] sm:$0xff] }
  0x59   : > { %1968 = vmatmul.mubr.bf16.vlgmr.msra.gmra.mrb[0].mxu1 %v2135_v29 }
  0x5a   : > { %1971 = vmatprep.mubr.bf16.mxu1 %v2142_v30 }
  0x5f   : > { %798 = vmatmul.mubr.bf16.gmra.mrb[4].mxu0 %v2138_v31 }
  0x60   : > { %805 = vmatprep.mubr.bf16.mxu0 %v2139_v32 }
  0x61   : > { %1972 = vmatmul.mubr.bf16.gmra.mrb[4].mxu1 %v2143_v33 }
  0x62   : > { %1975 = vmatprep.mubr.bf16.mxu1 %v2150_v34 }
  0x67   : > { %806 = vmatmul.mubr.bf16.gmra.mrb[8].mxu0 %v2141_v35 }
  0x68   : > { %813 = vmatprep.mubr.bf16.mxu0 %v2144_v36 }
  0x69   : > { %1976 = vmatmul.mubr.bf16.gmra.mrb[8].mxu1 %v2151_v37 }
  0x6a   : > { %1979 = vmatprep.mubr.bf16.mxu1 %v2158_v38  ;;  %v443_v38 = vld [vmem:[#allocation2 + $0x30] sm:$0xff] }
  0x6f   : > { %814 = vmatmul.mubr.bf16.gmra.mrb[12].mxu0 %v2146_v39 }
  0x70   : > { %821 = vmatprep.mubr.bf16.mxu0 %v2147_v40 }
  0x71   : > { %1980 = vmatmul.mubr.bf16.gmra.mrb[12].mxu1 %v2159_v41 }
  0x77   : > { %822 = vmatmul.mubr.bf16.gmra.mrb[16].mxu0 %v2149_v42 }
  0x78   : > { %829 = vmatprep.mubr.bf16.mxu0 %v2152_v43 }
  0x7f   : > { %830 = vmatmul.mubr.bf16.gmra.mrb[20].mxu0 %v2154_v44  ;;  %v444_v44 = vld [vmem:[#allocation2 + $0x38] sm:$0xff] }
  0x80   : > { %837 = vmatprep.mubr.bf16.mxu0 %v2155_v45 }
  0x87   : > { %838 = vmatmul.mubr.bf16.gmra.mrb[24].mxu0 %v2157_v46 }
  0x88   : > { %845 = vmatprep.mubr.bf16.mxu0 %v2160_v47 }
  0x8f   : > { %846 = vmatmul.mubr.bf16.gmra.mrb[28].mxu0 %v2162_v48 }
 0x12a   : > { %v1847_v49 = vpop.f32.mrb[0].mxu0 }
 0x12b   : > { %v1848_v50 = vpop.f32.mrb[1].mxu0 }
 0x12c   : > { %v1849_v51 = vadd.f32 %v1848_v50, %v1847_v49  ;;  %v1850_v52 = vpop.f32.mrb[2].mxu0  ;;  %v1969_v53 = vpop.f32.mrb[0].mxu1 }
 0x12d   : > { %v1851_v54 = vpop.f32.mrb[3].mxu0  ;;  %v888_v56 = vpop.f32.mrb[1].mxu1 }
 0x12e   : > { %v1852_v57 = vadd.f32 %v1851_v54, %v1850_v52  ;;  %v889_v58 = vadd.f32 %v1849_v51, %v888_v56  ;;  %v1970_v59 = vpop.f32.mrb[2].mxu1  ;;  %v445_v54 = vld [vmem:[#allocation2 + $0x40] sm:$0xff] }
 0x12f   : > { %v891_v61 = vpop.f32.mrb[3].mxu1 }
 0x130   : > { %v951_v62 = vadd.f32 %v889_v58, %v437_v55  ;;  %v892_v63 = vadd.f32 %v1852_v57, %v891_v61  ;;  %v446_v57 = vld [vmem:[#allocation2 + $0x48] sm:$0xff] }
 0x132   : > { %968 = vst.msk [vmem:[#allocation2] sm:$0xff] %vm354_vm0, %v951_v62  ;;  %v952_v0 = vadd.f32 %v892_v63, %v438_v60  ;;  %v1853_v1 = vpop.f32.mrb[4].mxu0 }
 0x133   : > { %v1854_v2 = vpop.f32.mrb[5].mxu0 }
 0x134   : > { %969 = vst.msk [vmem:[#allocation2 + $0x8] sm:$0xff] %vm354_vm0, %v952_v0  ;;  %v1855_v3 = vadd.f32 %v1854_v2, %v1853_v1  ;;  %v1856_v4 = vpop.f32.mrb[6].mxu0  ;;  %v1973_v5 = vpop.f32.mrb[4].mxu1  ;;  %v447_v1 = vld [vmem:[#allocation2 + $0x50] sm:$0xff] }
 0x135   : > { %v1857_v7 = vpop.f32.mrb[7].mxu0  ;;  %v904_v8 = vpop.f32.mrb[5].mxu1 }
 0x136   : > { %v897_v9 = vadd.f32 %v1969_v53, %v1855_v3  ;;  %v1858_v10 = vadd.f32 %v1857_v7, %v1856_v4  ;;  %v1974_v11 = vpop.f32.mrb[6].mxu1 }
 0x137   : > { %v907_v13 = vpop.f32.mrb[7].mxu1 }
 0x138   : > { %v953_v14 = vadd.f32 %v897_v9, %v439_v6  ;;  %v900_v15 = vadd.f32 %v1970_v59, %v1858_v10 }
 0x13a   : > { %970 = vst.msk [vmem:[#allocation2 + $0x10] sm:$0xff] %vm354_vm0, %v953_v14  ;;  %v954_v16 = vadd.f32 %v900_v15, %v440_v12  ;;  %v1859_v17 = vpop.f32.mrb[8].mxu0  ;;  %v449_v14 = vld [vmem:[#allocation2 + $0x60] sm:$0xff] }
 0x13b   : > { %v1860_v18 = vpop.f32.mrb[9].mxu0 }
 0x13c   : > { %971 = vst.msk [vmem:[#allocation2 + $0x18] sm:$0xff] %vm354_vm0, %v954_v16  ;;  %v1861_v19 = vadd.f32 %v1860_v18, %v1859_v17  ;;  %v1862_v20 = vpop.f32.mrb[10].mxu0  ;;  %v1977_v21 = vpop.f32.mrb[8].mxu1  ;;  %v450_v17 = vld [vmem:[#allocation2 + $0x68] sm:$0xff] }
 0x13d   : > { %v1863_v22 = vpop.f32.mrb[11].mxu0  ;;  %v920_v24 = vpop.f32.mrb[9].mxu1 }
 0x13e   : > { %v1864_v25 = vadd.f32 %v1863_v22, %v1862_v20  ;;  %v905_v26 = vadd.f32 %v1861_v19, %v904_v8  ;;  %v1978_v27 = vpop.f32.mrb[10].mxu1 }
 0x13f   : > { %v923_v29 = vpop.f32.mrb[11].mxu1 }
 0x140   : > { %v955_v30 = vadd.f32 %v905_v26, %v441_v23  ;;  %v908_v31 = vadd.f32 %v1864_v25, %v907_v13  ;;  %v451_v25 = vld [vmem:[#allocation2 + $0x70] sm:$0xff] }
 0x142   : > { %972 = vst.msk [vmem:[#allocation2 + $0x20] sm:$0xff] %vm354_vm0, %v955_v30  ;;  %v956_v32 = vadd.f32 %v908_v31, %v442_v28  ;;  %v1865_v33 = vpop.f32.mrb[12].mxu0 }
 0x143   : > { %v1866_v34 = vpop.f32.mrb[13].mxu0 }
 0x144   : > { %973 = vst.msk [vmem:[#allocation2 + $0x28] sm:$0xff] %vm354_vm0, %v956_v32  ;;  %v1867_v35 = vadd.f32 %v1866_v34, %v1865_v33  ;;  %v1868_v36 = vpop.f32.mrb[14].mxu0  ;;  %v1981_v37 = vpop.f32.mrb[12].mxu1 }
 0x145   : > { %v1869_v39 = vpop.f32.mrb[15].mxu0  ;;  %v936_v40 = vpop.f32.mrb[13].mxu1 }
 0x146   : > { %v913_v41 = vadd.f32 %v1973_v5, %v1867_v35  ;;  %v1870_v42 = vadd.f32 %v1869_v39, %v1868_v36  ;;  %v1982_v43 = vpop.f32.mrb[14].mxu1  ;;  %v448_v5 = vld [vmem:[#allocation2 + $0x58] sm:$0xff] }
 0x147   : > { %v939_v45 = vpop.f32.mrb[15].mxu1 }
 0x148   : > { %v957_v46 = vadd.f32 %v913_v41, %v443_v38  ;;  %v916_v47 = vadd.f32 %v1974_v11, %v1870_v42 }
 0x14a   : > { %974 = vst.msk [vmem:[#allocation2 + $0x30] sm:$0xff] %vm354_vm0, %v957_v46  ;;  %v958_v48 = vadd.f32 %v916_v47, %v444_v44  ;;  %v1871_v49 = vpop.f32.mrb[16].mxu0 }
 0x14b   : > { %v1872_v50 = vpop.f32.mrb[17].mxu0 }
 0x14c   : > { %975 = vst.msk [vmem:[#allocation2 + $0x38] sm:$0xff] %vm354_vm0, %v958_v48  ;;  %v1873_v51 = vadd.f32 %v1872_v50, %v1871_v49  ;;  %v1874_v52 = vpop.f32.mrb[18].mxu0 }
 0x14d   : > { %v1875_v53 = vpop.f32.mrb[19].mxu0 }
 0x14e   : > { %v1876_v55 = vadd.f32 %v1875_v53, %v1874_v52  ;;  %v921_v56 = vadd.f32 %v1873_v51, %v920_v24 }
 0x150   : > { %v959_v58 = vadd.f32 %v921_v56, %v445_v54  ;;  %v924_v59 = vadd.f32 %v1876_v55, %v923_v29  ;;  %v452_v29 = vld [vmem:[#allocation2 + $0x78] sm:$0xff] }
 0x152   : > { %976 = vst.msk [vmem:[#allocation2 + $0x40] sm:$0xff] %vm354_vm0, %v959_v58  ;;  %v960_v60 = vadd.f32 %v924_v59, %v446_v57  ;;  %v1877_v61 = vpop.f32.mrb[20].mxu0 }
 0x153   : > { %v1878_v62 = vpop.f32.mrb[21].mxu0 }
 0x154   : > { %977 = vst.msk [vmem:[#allocation2 + $0x48] sm:$0xff] %vm354_vm0, %v960_v60  ;;  %v1879_v63 = vadd.f32 %v1878_v62, %v1877_v61  ;;  %v1880_v0 = vpop.f32.mrb[22].mxu0 }
 0x155   : > { %v1881_v2 = vpop.f32.mrb[23].mxu0 }
 0x156   : > { %v929_v3 = vadd.f32 %v1977_v21, %v1879_v63  ;;  %v1882_v4 = vadd.f32 %v1881_v2, %v1880_v0 }
 0x158   : > { %v961_v6 = vadd.f32 %v929_v3, %v447_v1  ;;  %v932_v7 = vadd.f32 %v1978_v27, %v1882_v4 }
 0x15a   : > { %978 = vst.msk [vmem:[#allocation2 + $0x50] sm:$0xff] %vm354_vm0, %v961_v6  ;;  %v962_v8 = vadd.f32 %v932_v7, %v448_v5  ;;  %v1883_v9 = vpop.f32.mrb[24].mxu0 }
 0x15b   : > { %v1884_v10 = vpop.f32.mrb[25].mxu0 }
 0x15c   : > { %979 = vst.msk [vmem:[#allocation2 + $0x58] sm:$0xff] %vm354_vm0, %v962_v8  ;;  %v1885_v11 = vadd.f32 %v1884_v10, %v1883_v9  ;;  %v1886_v12 = vpop.f32.mrb[26].mxu0 }
 0x15d   : > { %v1887_v13 = vpop.f32.mrb[27].mxu0 }
 0x15e   : > { %v1888_v15 = vadd.f32 %v1887_v13, %v1886_v12  ;;  %v937_v16 = vadd.f32 %v1885_v11, %v936_v40 }
 0x160   : > { %v963_v18 = vadd.f32 %v937_v16, %v449_v14  ;;  %v940_v19 = vadd.f32 %v1888_v15, %v939_v45 }
 0x162   : > { %980 = vst.msk [vmem:[#allocation2 + $0x60] sm:$0xff] %vm354_vm0, %v963_v18  ;;  %v964_v20 = vadd.f32 %v940_v19, %v450_v17  ;;  %v1889_v21 = vpop.f32.mrb[28].mxu0 }
 0x163   : > { %v1890_v22 = vpop.f32.mrb[29].mxu0 }
 0x164   : > { %981 = vst.msk [vmem:[#allocation2 + $0x68] sm:$0xff] %vm354_vm0, %v964_v20  ;;  %v1891_v23 = vadd.f32 %v1890_v22, %v1889_v21  ;;  %v1892_v24 = vpop.f32.mrb[30].mxu0 }
 0x165   : > { %v1893_v26 = vpop.f32.mrb[31].mxu0 }
 0x166   : > { %v945_v27 = vadd.f32 %v1981_v37, %v1891_v23  ;;  %v1894_v28 = vadd.f32 %v1893_v26, %v1892_v24 }
 0x168   : > { %v965_v30 = vadd.f32 %v945_v27, %v451_v25  ;;  %v948_v31 = vadd.f32 %v1982_v43, %v1894_v28 }
 0x16a   : > { %982 = vst.msk [vmem:[#allocation2 + $0x70] sm:$0xff] %vm354_vm0, %v965_v30  ;;  %v966_v32 = vadd.f32 %v948_v31, %v452_v29 }
 0x16c   : > { %983 = vst.msk [vmem:[#allocation2 + $0x78] sm:$0xff] %vm354_vm0, %v966_v32 }
 0x16d PF: > { %v1023_v33 = vld [vmem:[%s2661_s5 + $0x20] sm:$0xff]  ;;  %v1024_v34 = vld [vmem:[%s2661_s5 + $0x28] sm:$0xff]  ;;  %v1025_v38 = vld [vmem:[%s2661_s5 + $0x30] sm:$0xff] }
 0x16e   : > { %v1019_v35 = vld [vmem:[%s2661_s5] sm:$0xff]  ;;  %v2047_v36 = vpack.c.bf16 %v1024_v34, %v1023_v33  ;;  %v1020_v37 = vld [vmem:[%s2661_s5 + $0x8] sm:$0xff]  ;;  %v1026_v39 = vld [vmem:[%s2661_s5 + $0x38] sm:$0xff] }
 0x16f   : > { %v2055_v40 = vpack.c.bf16 %v1020_v37, %v1019_v35  ;;  %v2051_v41 = vpack.c.bf16 %v1026_v39, %v1025_v38  ;;  %v1021_v42 = vld [vmem:[%s2661_s5 + $0x10] sm:$0xff]  ;;  %v1022_v43 = vld [vmem:[%s2661_s5 + $0x18] sm:$0xff]  ;;  %v987_v44 = vld [vmem:[#allocation2] sm:$0xff] }
 0x170   : > { %2048 = vmatprep.subr.bf16.mxu1 %v2047_v36  ;;  %v2059_v45 = vpack.c.bf16 %v1022_v43, %v1021_v42  ;;  %v1003_v46 = vld [vmem:[%s2344_s21] sm:$0xff]  ;;  %v988_v49 = vld [vmem:[#allocation2 + $0x8] sm:$0xff]  ;;  %v989_v51 = vld [vmem:[#allocation2 + $0x10] sm:$0xff] }
 0x171   : > { %2056 = vmatprep.subr.bf16.mxu0 %v2055_v40  ;;  %2050 = vmatpush3.bf16.msra.mxu1 %v2047_v36  ;;  %v1043_v47 = vmul.f32 %v1003_v46, %v987_v44  ;;  %v1027_v48 = vadd.f32 %v1003_v46, %v987_v44  ;;  %v1004_v50 = vld [vmem:[%s2344_s21 + $0x8] sm:$0xff]  ;;  %v1005_v52 = vld [vmem:[%s2344_s21 + $0x10] sm:$0xff]  ;;  %v990_v56 = vld [vmem:[#allocation2 + $0x18] sm:$0xff] }
 0x172   : > { %2058 = vmatpush3.bf16.msra.mxu0 %v2055_v40  ;;  %2052 = vmatprep.subr.bf16.mxu1 %v2051_v41  ;;  %v1044_v53 = vmul.f32 %v1004_v50, %v988_v49  ;;  %v1028_v54 = vadd.f32 %v1004_v50, %v988_v49  ;;  %v1045_v55 = vmul.f32 %v1005_v52, %v989_v51  ;;  %v1006_v57 = vld [vmem:[%s2344_s21 + $0x18] sm:$0xff]  ;;  %v991_v59 = vld [vmem:[#allocation2 + $0x20] sm:$0xff]  ;;  %v992_v0 = vld [vmem:[#allocation2 + $0x28] sm:$0xff] }
 0x173   : > { %2060 = vmatprep.subr.bf16.mxu0 %v2059_v45  ;;  %1991 = vmatprep.mubr.msk.f32.mxu1 %vm354_vm0, %v1043_v47  ;;  %v1029_v58 = vadd.f32 %v1005_v52, %v989_v51  ;;  %v1007_v60 = vld [vmem:[%s2344_s21 + $0x20] sm:$0xff]  ;;  %v1046_v61 = vmul.f32 %v1006_v57, %v990_v56  ;;  %v1030_v62 = vadd.f32 %v1006_v57, %v990_v56  ;;  %v1008_v1 = vld [vmem:[%s2344_s21 + $0x28] sm:$0xff]  ;;  %v993_v3 = vld [vmem:[#allocation2 + $0x30] sm:$0xff] }
 0x174   : > { %2023 = vmatprep.mubr.msk.f32.mxu0 %vm354_vm0, %v1027_v48  ;;  %v1047_v63 = vmul.f32 %v1007_v60, %v991_v59  ;;  %v1031_v2 = vadd.f32 %v1007_v60, %v991_v59  ;;  %v1009_v4 = vld [vmem:[%s2344_s21 + $0x30] sm:$0xff]  ;;  %v1048_v5 = vmul.f32 %v1008_v1, %v992_v0  ;;  %v1032_v6 = vadd.f32 %v1008_v1, %v992_v0  ;;  %v994_v8 = vld [vmem:[#allocation2 + $0x38] sm:$0xff]  ;;  %v995_v11 = vld [vmem:[#allocation2 + $0x40] sm:$0xff] }
 0x175   : > { %2054 = vmatpush3.bf16.msra.mxu1 %v2051_v41  ;;  %v1049_v7 = vmul.f32 %v1009_v4, %v993_v3  ;;  %v1010_v9 = vld [vmem:[%s2344_s21 + $0x38] sm:$0xff]  ;;  %v1033_v10 = vadd.f32 %v1009_v4, %v993_v3  ;;  %v1011_v12 = vld [vmem:[%s2344_s21 + $0x40] sm:$0xff]  ;;  %v996_v16 = vld [vmem:[#allocation2 + $0x48] sm:$0xff] }
 0x176   : > { %2062 = vmatpush3.bf16.msra.mxu0 %v2059_v45  ;;  %v1050_v13 = vmul.f32 %v1010_v9, %v994_v8  ;;  %v1034_v14 = vadd.f32 %v1010_v9, %v994_v8  ;;  %v1051_v15 = vmul.f32 %v1011_v12, %v995_v11  ;;  %v1012_v17 = vld [vmem:[%s2344_s21 + $0x48] sm:$0xff]  ;;  %v1035_v18 = vadd.f32 %v1011_v12, %v995_v11  ;;  %v997_v19 = vld [vmem:[#allocation2 + $0x50] sm:$0xff]  ;;  %v998_v24 = vld [vmem:[#allocation2 + $0x58] sm:$0xff] }
 0x177   : > { %v1013_v20 = vld [vmem:[%s2344_s21 + $0x50] sm:$0xff]  ;;  %v1052_v21 = vmul.f32 %v1012_v17, %v996_v16  ;;  %v1036_v22 = vadd.f32 %v1012_v17, %v996_v16  ;;  %v1014_v25 = vld [vmem:[%s2344_s21 + $0x58] sm:$0xff]  ;;  %v999_v27 = vld [vmem:[#allocation2 + $0x60] sm:$0xff] }
 0x178   : > { %1992 = vmatmul.mubr.msk.f32.vlgmr.msra.gmra.mrb[0].mxu1 %vm354_vm0, %v1044_v53  ;;  %v1053_v23 = vmul.f32 %v1013_v20, %v997_v19  ;;  %v1037_v26 = vadd.f32 %v1013_v20, %v997_v19  ;;  %v1015_v28 = vld [vmem:[%s2344_s21 + $0x60] sm:$0xff]  ;;  %v1054_v29 = vmul.f32 %v1014_v25, %v998_v24  ;;  %v1038_v30 = vadd.f32 %v1014_v25, %v998_v24  ;;  %v1000_v32 = vld [vmem:[#allocation2 + $0x68] sm:$0xff]  ;;  %v1001_v35 = vld [vmem:[#allocation2 + $0x70] sm:$0xff] }
 0x179   : > { %2024 = vmatmul.mubr.msk.f32.vlgmr.msra.gmra.mrb[0].mxu0 %vm354_vm0, %v1028_v54  ;;  %1994 = vmatprep.mubr.msk.f32.mxu1 %vm354_vm0, %v1045_v55  ;;  %v1055_v31 = vmul.f32 %v1015_v28, %v999_v27  ;;  %v1016_v33 = vld [vmem:[%s2344_s21 + $0x68] sm:$0xff]  ;;  %v1039_v34 = vadd.f32 %v1015_v28, %v999_v27  ;;  %v1017_v36 = vld [vmem:[%s2344_s21 + $0x70] sm:$0xff]  ;;  %v1002_v40 = vld [vmem:[#allocation2 + $0x78] sm:$0xff] }
 0x17a   : > { %2026 = vmatprep.mubr.msk.f32.mxu0 %vm354_vm0, %v1029_v58  ;;  %v1056_v37 = vmul.f32 %v1016_v33, %v1000_v32  ;;  %v1040_v38 = vadd.f32 %v1016_v33, %v1000_v32  ;;  %v1057_v39 = vmul.f32 %v1017_v36, %v1001_v35  ;;  %v1018_v41 = vld [vmem:[%s2344_s21 + $0x78] sm:$0xff]  ;;  %v1041_v42 = vadd.f32 %v1017_v36, %v1001_v35  ;;  %v2502_v47 = vld [vmem:[%s2662_s6] ss:$0 sm:$0xff] }
 0x17b   : > { %v1058_v43 = vmul.f32 %v1018_v41, %v1002_v40  ;;  %v1042_v44 = vadd.f32 %v1018_v41, %v1002_v40 }
 0x17c   : > { %1995 = vmatmul.mubr.msk.f32.gmra.mrb[2].mxu1 %vm354_vm0, %v1046_v61 }
 0x17d   : > { %2027 = vmatmul.mubr.msk.f32.gmra.mrb[2].mxu0 %vm354_vm0, %v1030_v62  ;;  %1997 = vmatprep.mubr.msk.f32.mxu1 %vm354_vm0, %v1047_v63 }
 0x17e   : > { %2029 = vmatprep.mubr.msk.f32.mxu0 %vm354_vm0, %v1031_v2 }
 0x180   : > { %1998 = vmatmul.mubr.msk.f32.gmra.mrb[4].mxu1 %vm354_vm0, %v1048_v5 }
 0x181   : > { %2030 = vmatmul.mubr.msk.f32.gmra.mrb[4].mxu0 %vm354_vm0, %v1032_v6  ;;  %2000 = vmatprep.mubr.msk.f32.mxu1 %vm354_vm0, %v1049_v7 }
 0x182   : > { %2032 = vmatprep.mubr.msk.f32.mxu0 %vm354_vm0, %v1033_v10 }
 0x184   : > { %2001 = vmatmul.mubr.msk.f32.gmra.mrb[6].mxu1 %vm354_vm0, %v1050_v13 }
 0x185   : > { %2033 = vmatmul.mubr.msk.f32.gmra.mrb[6].mxu0 %vm354_vm0, %v1034_v14  ;;  %2003 = vmatprep.mubr.msk.f32.mxu1 %vm354_vm0, %v1051_v15 }
 0x186   : > { %2035 = vmatprep.mubr.msk.f32.mxu0 %vm354_vm0, %v1035_v18 }
 0x188   : > { %2004 = vmatmul.mubr.msk.f32.gmra.mrb[8].mxu1 %vm354_vm0, %v1052_v21 }
 0x189   : > { %2036 = vmatmul.mubr.msk.f32.gmra.mrb[8].mxu0 %vm354_vm0, %v1036_v22  ;;  %2006 = vmatprep.mubr.msk.f32.mxu1 %vm354_vm0, %v1053_v23 }
 0x18a   : > { %2038 = vmatprep.mubr.msk.f32.mxu0 %vm354_vm0, %v1037_v26 }
 0x18c   : > { %2007 = vmatmul.mubr.msk.f32.gmra.mrb[10].mxu1 %vm354_vm0, %v1054_v29 }
 0x18d   : > { %2039 = vmatmul.mubr.msk.f32.gmra.mrb[10].mxu0 %vm354_vm0, %v1038_v30  ;;  %2009 = vmatprep.mubr.msk.f32.mxu1 %vm354_vm0, %v1055_v31 }
 0x18e   : > { %2041 = vmatprep.mubr.msk.f32.mxu0 %vm354_vm0, %v1039_v34 }
 0x190   : > { %2010 = vmatmul.mubr.msk.f32.gmra.mrb[12].mxu1 %vm354_vm0, %v1056_v37 }
 0x191   : > { %2042 = vmatmul.mubr.msk.f32.gmra.mrb[12].mxu0 %vm354_vm0, %v1040_v38  ;;  %2012 = vmatprep.mubr.msk.f32.mxu1 %vm354_vm0, %v1057_v39 }
 0x192   : > { %2044 = vmatprep.mubr.msk.f32.mxu0 %vm354_vm0, %v1041_v42 }
 0x194   : > { %2013 = vmatmul.mubr.msk.f32.gmra.mrb[14].mxu1 %vm354_vm0, %v1058_v43 }
 0x195   : > { %2045 = vmatmul.mubr.msk.f32.gmra.mrb[14].mxu0 %vm354_vm0, %v1042_v44 }
 0x24b   : > { %v1993_v45 = vpop.f32.mrb[0].mxu1 }
 0x24c   : > { %v2025_v46 = vpop.f32.mrb[0].mxu0  ;;  %v1174_v48 = vpop.f32.mrb[1].mxu1 }
 0x24d   : > { %v1373_v49 = vadd.f32 %v2025_v46, %v1993_v45  ;;  %v1367_v50 = vpop.f32.mrb[1].mxu0 }
 0x24e   : > { %v1368_v51 = vadd.f32 %v1367_v50, %v1174_v48 }
 0x24f   : > { %v1454_v52 = vadd.f32 %v2502_v47, %v1373_v49  ;;  %v1996_v53 = vpop.f32.mrb[2].mxu1 }
 0x250   : > { %v1453_v54 = vadd.f32 %v2502_v47, %v1368_v51  ;;  %v2028_v55 = vpop.f32.mrb[2].mxu0  ;;  %v1184_v56 = vpop.f32.mrb[3].mxu1 }
 0x251   : > { %v1383_v57 = vadd.f32 %v2028_v55, %v1996_v53  ;;  %v1377_v58 = vpop.f32.mrb[3].mxu0  ;;  %vm1470_vm1 = vcmp.ge.f32.partialorder %v1454_v52, 0.0  ;;  %v1486_v59 = vmul.f32 0.2, %v1454_v52 }
 0x252   : > { %v1378_v60 = vadd.f32 %v1377_v58, %v1184_v56  ;;  %vm1469_vm2 = vcmp.ge.f32.partialorder %v1453_v54, 0.0  ;;  %v1485_v61 = vmul.f32 0.2, %v1453_v54 }
 0x253   : > { %v1456_v62 = vadd.f32 %v2502_v47, %v1383_v57  ;;  %v1999_v63 = vpop.f32.mrb[4].mxu1  ;;  %v2507_v0 = vsel %vm1470_vm1, %v1454_v52, %v1486_v59 }
 0x254   : > { %v1455_v1 = vadd.f32 %v2502_v47, %v1378_v60  ;;  %v2031_v2 = vpop.f32.mrb[4].mxu0  ;;  %v1194_v3 = vpop.f32.mrb[5].mxu1  ;;  %v1518_v4 = vmul.f32 %v2507_v0, %v2507_v0  ;;  %v2512_v5 = vsel %vm1469_vm2, %v1453_v54, %v1485_v61 }
 0x255   : > { %v1393_v6 = vadd.f32 %v2031_v2, %v1999_v63  ;;  %v1387_v7 = vpop.f32.mrb[5].mxu0  ;;  %vm1472_vm3 = vcmp.ge.f32.partialorder %v1456_v62, 0.0  ;;  %v1488_v8 = vmul.f32 0.2, %v1456_v62  ;;  %v1517_v9 = vmul.f32 %v2512_v5, %v2512_v5 }
 0x256   : > { %v1388_v10 = vadd.f32 %v1387_v7, %v1194_v3  ;;  %v1536_v11 = vsel %vm354_vm0, %v1518_v4, 0.0  ;;  %vm1471_vm4 = vcmp.ge.f32.partialorder %v1455_v1, 0.0  ;;  %v1487_v12 = vmul.f32 0.2, %v1455_v1 }
 0x257   : > { %v1458_v13 = vadd.f32 %v2502_v47, %v1393_v6  ;;  %1537 = vadd.xlane.f32.xlu0 %v1536_v11  ;;  %v2002_v14 = vpop.f32.mrb[6].mxu1  ;;  %v2518_v15 = vsel %vm1472_vm3, %v1456_v62, %v1488_v8  ;;  %v1533_v20 = vsel %vm354_vm0, %v1517_v9, 0.0 }
 0x258   : > { %v1457_v16 = vadd.f32 %v2502_v47, %v1388_v10  ;;  %v2034_v17 = vpop.f32.mrb[6].mxu0  ;;  %v1204_v18 = vpop.f32.mrb[7].mxu1  ;;  %v1520_v19 = vmul.f32 %v2518_v15, %v2518_v15  ;;  %v2524_v21 = vsel %vm1471_vm4, %v1455_v1, %v1487_v12 }
 0x259   : > { %v1403_v22 = vadd.f32 %v2034_v17, %v2002_v14  ;;  %v1397_v23 = vpop.f32.mrb[7].mxu0  ;;  %v1519_v24 = vmul.f32 %v2524_v21, %v2524_v21  ;;  %vm1474_vm5 = vcmp.ge.f32.partialorder %v1458_v13, 0.0  ;;  %v1490_v25 = vmul.f32 0.2, %v1458_v13 }
 0x25a   : > { %v1398_v26 = vadd.f32 %v1397_v23, %v1204_v18  ;;  %v1542_v27 = vsel %vm354_vm0, %v1520_v19, 0.0  ;;  %vm1473_vm6 = vcmp.ge.f32.partialorder %v1457_v16, 0.0  ;;  %v1489_v28 = vmul.f32 0.2, %v1457_v16 }
 0x25b   : > { %v1460_v29 = vadd.f32 %v2502_v47, %v1403_v22  ;;  %1543 = vadd.xlane.f32.xlu1 %v1542_v27  ;;  %1534 = vadd.xlane.f32.xlu0 %v1533_v20  ;;  %v2005_v30 = vpop.f32.mrb[8].mxu1  ;;  %v2530_v31 = vsel %vm1474_vm5, %v1458_v13, %v1490_v25  ;;  %v1539_v42 = vsel %vm354_vm0, %v1519_v24, 0.0 }
 0x25c   : > { %v1459_v32 = vadd.f32 %v2502_v47, %v1398_v26  ;;  %v2037_v33 = vpop.f32.mrb[8].mxu0  ;;  %v1214_v34 = vpop.f32.mrb[9].mxu1  ;;  %v2533_v35 = vsel %vm1473_vm6, %v1457_v16, %v1489_v28  ;;  %v1522_v36 = vmul.f32 %v2530_v31, %v2530_v31 }
 0x25d   : > { %v1413_v37 = vadd.f32 %v2037_v33, %v2005_v30  ;;  %v1407_v38 = vpop.f32.mrb[9].mxu0  ;;  %v1521_v39 = vmul.f32 %v2533_v35, %v2533_v35  ;;  %vm1476_vm7 = vcmp.ge.f32.partialorder %v1460_v29, 0.0  ;;  %v1492_v40 = vmul.f32 0.2, %v1460_v29 }
 0x25e   : > { %v1408_v41 = vadd.f32 %v1407_v38, %v1214_v34  ;;  %vm1475_vm8 = vcmp.ge.f32.partialorder %v1459_v32, 0.0  ;;  %v1491_v43 = vmul.f32 0.2, %v1459_v32  ;;  %v1548_v52 = vsel %vm354_vm0, %v1522_v36, 0.0 }
 0x25f   : > { %v1462_v44 = vadd.f32 %v2502_v47, %v1413_v37  ;;  %1540 = vadd.xlane.f32.xlu1 %v1539_v42  ;;  %v2008_v45 = vpop.f32.mrb[10].mxu1  ;;  %v1545_v46 = vsel %vm354_vm0, %v1521_v39, 0.0  ;;  %v2542_v48 = vsel %vm1476_vm7, %v1460_v29, %v1492_v40 }
 0x260   : > { %v1461_v49 = vadd.f32 %v2502_v47, %v1408_v41  ;;  %v2040_v50 = vpop.f32.mrb[10].mxu0  ;;  %1546 = vadd.xlane.f32.xlu0 %v1545_v46  ;;  %v1224_v51 = vpop.f32.mrb[11].mxu1  ;;  %v2546_v53 = vsel %vm1475_vm8, %v1459_v32, %v1491_v43  ;;  %v1524_v59 = vmul.f32 %v2542_v48, %v2542_v48 }
 0x261   : > { %v1423_v54 = vadd.f32 %v2040_v50, %v2008_v45  ;;  %v1417_v55 = vpop.f32.mrb[11].mxu0  ;;  %v1523_v56 = vmul.f32 %v2546_v53, %v2546_v53  ;;  %vm1478_vm9 = vcmp.ge.f32.partialorder %v1462_v44, 0.0  ;;  %v1494_v57 = vmul.f32 0.2, %v1462_v44 }
 0x262   : > { %v1418_v58 = vadd.f32 %v1417_v55, %v1224_v51  ;;  %vm1477_vm10 = vcmp.ge.f32.partialorder %v1461_v49, 0.0  ;;  %v1493_v60 = vmul.f32 0.2, %v1461_v49  ;;  %v1554_v13 = vsel %vm354_vm0, %v1524_v59, 0.0 }
 0x263   : > { %v1464_v61 = vadd.f32 %v2502_v47, %v1423_v54  ;;  %1549 = vadd.xlane.f32.xlu1 %v1548_v52  ;;  %v2011_v62 = vpop.f32.mrb[12].mxu1  ;;  %v1551_v63 = vsel %vm354_vm0, %v1523_v56, 0.0  ;;  %v2554_v1 = vsel %vm1478_vm9, %v1462_v44, %v1494_v57 }
 0x264   : > { %v1463_v2 = vadd.f32 %v2502_v47, %v1418_v58  ;;  %v2043_v3 = vpop.f32.mrb[12].mxu0  ;;  %1552 = vadd.xlane.f32.xlu0 %v1551_v63  ;;  %v1234_v4 = vpop.f32.mrb[13].mxu1  ;;  %v2557_v6 = vsel %vm1477_vm10, %v1461_v49, %v1493_v60  ;;  %v1526_v7 = vmul.f32 %v2554_v1, %v2554_v1 }
 0x265   : > { %v1433_v8 = vadd.f32 %v2043_v3, %v2011_v62  ;;  %v1427_v9 = vpop.f32.mrb[13].mxu0  ;;  %v1525_v10 = vmul.f32 %v2557_v6, %v2557_v6  ;;  %vm1480_vm11 = vcmp.ge.f32.partialorder %v1464_v61, 0.0  ;;  %v1496_v11 = vmul.f32 0.2, %v1464_v61 }
 0x266   : > { %v1428_v12 = vadd.f32 %v1427_v9, %v1234_v4  ;;  %vm1479_vm12 = vcmp.ge.f32.partialorder %v1463_v2, 0.0  ;;  %v1495_v14 = vmul.f32 0.2, %v1463_v2  ;;  %v1560_v24 = vsel %vm354_vm0, %v1526_v7, 0.0 }
 0x267   : > { %v1466_v16 = vadd.f32 %v2502_v47, %v1433_v8  ;;  %1555 = vadd.xlane.f32.xlu1 %v1554_v13  ;;  %v2014_v17 = vpop.f32.mrb[14].mxu1  ;;  %v1557_v18 = vsel %vm354_vm0, %v1525_v10, 0.0  ;;  %v2566_v19 = vsel %vm1480_vm11, %v1464_v61, %v1496_v11 }
 0x268   : > { %v1465_v20 = vadd.f32 %v2502_v47, %v1428_v12  ;;  %v2046_v22 = vpop.f32.mrb[14].mxu0  ;;  %1558 = vadd.xlane.f32.xlu0 %v1557_v18  ;;  %v1244_v23 = vpop.f32.mrb[15].mxu1  ;;  %v2570_v25 = vsel %vm1479_vm12, %v1463_v2, %v1495_v14  ;;  %v1528_v32 = vmul.f32 %v2566_v19, %v2566_v19 }
 0x269   : > { %v1443_v26 = vadd.f32 %v2046_v22, %v2014_v17  ;;  %v1437_v27 = vpop.f32.mrb[15].mxu0  ;;  %v1527_v28 = vmul.f32 %v2570_v25, %v2570_v25  ;;  %vm1482_vm13 = vcmp.ge.f32.partialorder %v1466_v16, 0.0  ;;  %v1498_v29 = vmul.f32 0.2, %v1466_v16 }
 0x26a   : > { %v1438_v30 = vadd.f32 %v1437_v27, %v1244_v23  ;;  %vm1481_vm14 = vcmp.ge.f32.partialorder %v1465_v20, 0.0  ;;  %v1497_v33 = vmul.f32 0.2, %v1465_v20  ;;  %v1566_v42 = vsel %vm354_vm0, %v1528_v32, 0.0 }
 0x26b   : > { %v1468_v34 = vadd.f32 %v2502_v47, %v1443_v26  ;;  %1561 = vadd.xlane.f32.xlu1 %v1560_v24  ;;  %v1563_v36 = vsel %vm354_vm0, %v1527_v28, 0.0  ;;  %v2578_v37 = vsel %vm1482_vm13, %v1466_v16, %v1498_v29 }
 0x26c   : > { %v1467_v38 = vadd.f32 %v2502_v47, %v1438_v30  ;;  %1564 = vadd.xlane.f32.xlu0 %v1563_v36  ;;  %v2581_v39 = vsel %vm1481_vm14, %v1465_v20, %v1497_v33  ;;  %v1530_v43 = vmul.f32 %v2578_v37, %v2578_v37 }
 0x26d   : > { %v1529_v40 = vmul.f32 %v2581_v39, %v2581_v39  ;;  %vm1484_vm15 = vcmp.ge.f32.partialorder %v1468_v34, 0.0  ;;  %v1500_v41 = vmul.f32 0.2, %v1468_v34 }
 0x26e   : > { %vm1483_vm1 = vcmp.ge.f32.partialorder %v1467_v38, 0.0  ;;  %v1499_v44 = vmul.f32 0.2, %v1467_v38  ;;  %v1572_v50 = vsel %vm354_vm0, %v1530_v43, 0.0 }
 0x26f   : > { %1567 = vadd.xlane.f32.xlu1 %v1566_v42  ;;  %v1569_v45 = vsel %vm354_vm0, %v1529_v40, 0.0  ;;  %v2589_v46 = vsel %vm1484_vm15, %v1468_v34, %v1500_v41 }
 0x270   : > { %1570 = vadd.xlane.f32.xlu0 %v1569_v45  ;;  %v2591_v47 = vsel %vm1483_vm1, %v1467_v38, %v1499_v44  ;;  %v1532_v51 = vmul.f32 %v2589_v46, %v2589_v46 }
 0x271   : > { %v1531_v49 = vmul.f32 %v2591_v47, %v2591_v47 }
 0x272   : > { %v1578_v54 = vsel %vm354_vm0, %v1532_v51, 0.0 }
 0x273   : > { %1573 = vadd.xlane.f32.xlu1 %v1572_v50  ;;  %v1575_v52 = vsel %vm354_vm0, %v1531_v49, 0.0 }
 0x274   : > { %1576 = vadd.xlane.f32.xlu0 %v1575_v52 }
 0x277   : > { %1579 = vadd.xlane.f32.xlu1 %v1578_v54 }
 0x2e4   : > { %v1538_v55 = vpop.xlane.xlu0 %1537 }
 0x2e5   : > { %v1582_v56 = vmax.f32 %v1538_v55, 1e-24 }
 0x2e7   : > { %2163 = vrsqrt.f32 %v1582_v56 }
 0x2e8   : > { %v1544_v57 = vpop.xlane.xlu1 %1543  ;;  %v1535_v58 = vpop.xlane.xlu0 %1534 }
 0x2e9   : > { %v1584_v59 = vmax.f32 %v1544_v57, 1e-24  ;;  %v1581_v60 = vmax.f32 %v1535_v58, 1e-24 }
 0x2eb   : > { %2165 = vrsqrt.f32 %v1584_v59 }
 0x2ec   : > { %2167 = vrsqrt.f32 %v1581_v60  ;;  %v1541_v61 = vpop.xlane.xlu1 %1540 }
 0x2ed   : > { %v1583_v62 = vmax.f32 %v1541_v61, 1e-24  ;;  %v1547_v63 = vpop.xlane.xlu0 %1546 }
 0x2ee   : > { %v1585_v2 = vmax.f32 %v1547_v63, 1e-24 }
 0x2ef   : > { %2169 = vrsqrt.f32 %v1583_v62 }
 0x2f0   : > { %2171 = vrsqrt.f32 %v1585_v2  ;;  %v1550_v3 = vpop.xlane.xlu1 %1549 }
 0x2f1   : > { %v2164_v4 = vpop.eup %2163  ;;  %v1586_v7 = vmax.f32 %v1550_v3, 1e-24  ;;  %v1553_v8 = vpop.xlane.xlu0 %1552 }
 0x2f2   : > { %v1614_v9 = vmul.f32 %v2164_v4, %v2507_v0  ;;  %v1587_v10 = vmax.f32 %v1553_v8, 1e-24 }
 0x2f3   : > { %2173 = vrsqrt.f32 %v1586_v7 }
 0x2f4   : > { %1630 = vst.msk [vmem:[%s2349_s24 + $0x8] sm:$0xff] %vm354_vm0, %v1614_v9  ;;  %2175 = vrsqrt.f32 %v1587_v10  ;;  %v1556_v11 = vpop.xlane.xlu1 %1555 }
 0x2f5   : > { %v2166_v12 = vpop.eup %2165  ;;  %v1588_v13 = vmax.f32 %v1556_v11, 1e-24  ;;  %v1559_v14 = vpop.xlane.xlu0 %1558 }
 0x2f6   : > { %v2168_v16 = vpop.eup %2167  ;;  %v1616_v17 = vmul.f32 %v2166_v12, %v2518_v15  ;;  %v1589_v18 = vmax.f32 %v1559_v14, 1e-24 }
 0x2f7   : > { %v1613_v20 = vmul.f32 %v2168_v16, %v2512_v5  ;;  %2177 = vrsqrt.f32 %v1588_v13 }
 0x2f8   : > { %1632 = vst.msk [vmem:[%s2349_s24 + $0x18] sm:$0xff] %vm354_vm0, %v1616_v17  ;;  %2179 = vrsqrt.f32 %v1589_v18  ;;  %v1562_v0 = vpop.xlane.xlu1 %1561 }
 0x2f9   : > { %v2170_v22 = vpop.eup %2169  ;;  %1629 = vst.msk [vmem:[%s2349_s24] sm:$0xff] %vm354_vm0, %v1613_v20  ;;  %v1590_v23 = vmax.f32 %v1562_v0, 1e-24  ;;  %v1565_v24 = vpop.xlane.xlu0 %1564 }
 0x2fa   : > { %v2172_v26 = vpop.eup %2171  ;;  %v1615_v27 = vmul.f32 %v2170_v22, %v2524_v21  ;;  %v1591_v15 = vmax.f32 %v1565_v24, 1e-24 }
 0x2fb   : > { %v1617_v28 = vmul.f32 %v2172_v26, %v2533_v35  ;;  %2181 = vrsqrt.f32 %v1590_v23 }
 0x2fc   : > { %1631 = vst.msk [vmem:[%s2349_s24 + $0x10] sm:$0xff] %vm354_vm0, %v1615_v27  ;;  %2183 = vrsqrt.f32 %v1591_v15  ;;  %v1568_v5 = vpop.xlane.xlu1 %1567 }
 0x2fd   : > { %v2174_v29 = vpop.eup %2173  ;;  %1633 = vst.msk [vmem:[%s2349_s24 + $0x20] sm:$0xff] %vm354_vm0, %v1617_v28  ;;  %v1592_v30 = vmax.f32 %v1568_v5, 1e-24  ;;  %v1571_v32 = vpop.xlane.xlu0 %1570 }
 0x2fe   : > { %v2176_v33 = vpop.eup %2175  ;;  %v1618_v34 = vmul.f32 %v2174_v29, %v2530_v31  ;;  %v1593_v21 = vmax.f32 %v1571_v32, 1e-24 }
 0x2ff   : > { %v1619_v36 = vmul.f32 %v2176_v33, %v2546_v53  ;;  %2185 = vrsqrt.f32 %v1592_v30 }
 0x300   : > { %1634 = vst.msk [vmem:[%s2349_s24 + $0x28] sm:$0xff] %vm354_vm0, %v1618_v34  ;;  %2187 = vrsqrt.f32 %v1593_v21  ;;  %v1574_v35 = vpop.xlane.xlu1 %1573 }
 0x301   : > { %v2178_v38 = vpop.eup %2177  ;;  %1635 = vst.msk [vmem:[%s2349_s24 + $0x30] sm:$0xff] %vm354_vm0, %v1619_v36  ;;  %v1594_v40 = vmax.f32 %v1574_v35, 1e-24  ;;  %v1577_v41 = vpop.xlane.xlu0 %1576 }
 0x302   : > { %v2180_v42 = vpop.eup %2179  ;;  %v1620_v43 = vmul.f32 %v2178_v38, %v2542_v48  ;;  %v1595_v31 = vmax.f32 %v1577_v41, 1e-24 }
 0x303   : > { %v1621_v44 = vmul.f32 %v2180_v42, %v2557_v6  ;;  %2189 = vrsqrt.f32 %v1594_v40 }
 0x304   : > { %1636 = vst.msk [vmem:[%s2349_s24 + $0x38] sm:$0xff] %vm354_vm0, %v1620_v43  ;;  %2191 = vrsqrt.f32 %v1595_v31  ;;  %v1580_v53 = vpop.xlane.xlu1 %1579 }
 0x305   : > { %v2182_v45 = vpop.eup %2181  ;;  %1637 = vst.msk [vmem:[%s2349_s24 + $0x40] sm:$0xff] %vm354_vm0, %v1621_v44  ;;  %v1596_v49 = vmax.f32 %v1580_v53, 1e-24 }
 0x306   : > { %v2184_v50 = vpop.eup %2183  ;;  %v1622_v51 = vmul.f32 %v2182_v45, %v2554_v1 }
 0x307   : > { %v1623_v48 = vmul.f32 %v2184_v50, %v2570_v25  ;;  %2193 = vrsqrt.f32 %v1596_v49 }
 0x308   : > { %1638 = vst.msk [vmem:[%s2349_s24 + $0x48] sm:$0xff] %vm354_vm0, %v1622_v51 }
 0x309   : > { %v2186_v6 = vpop.eup %2185  ;;  %1639 = vst.msk [vmem:[%s2349_s24 + $0x50] sm:$0xff] %vm354_vm0, %v1623_v48 }
 0x30a   : > { %v2188_v52 = vpop.eup %2187  ;;  %v1624_v54 = vmul.f32 %v2186_v6, %v2566_v19 }
 0x30b   : > { %v1625_v55 = vmul.f32 %v2188_v52, %v2581_v39 }
 0x30c   : > { %1640 = vst.msk [vmem:[%s2349_s24 + $0x58] sm:$0xff] %vm354_vm0, %v1624_v54 }
 0x30d   : > { %v2190_v56 = vpop.eup %2189  ;;  %1641 = vst.msk [vmem:[%s2349_s24 + $0x60] sm:$0xff] %vm354_vm0, %v1625_v55 }
 0x30e   : > { %v2192_v1 = vpop.eup %2191  ;;  %v1626_v25 = vmul.f32 %v2190_v56, %v2578_v37 }
 0x30f   : > { %v1627_v57 = vmul.f32 %v2192_v1, %v2591_v47 }
 0x310   : > { %1642 = vst.msk [vmem:[%s2349_s24 + $0x68] sm:$0xff] %vm354_vm0, %v1626_v25 }
 0x311   : > { %v2194_v58 = vpop.eup %2193  ;;  %1643 = vst.msk [vmem:[%s2349_s24 + $0x70] sm:$0xff] %vm354_vm0, %v1627_v57 }
 0x312   : > { %v1628_v59 = vmul.f32 %v2194_v58, %v2589_v46 }
 0x314   : > { %1644 = vst.msk [vmem:[%s2349_s24 + $0x78] sm:$0xff] %vm354_vm0, %v1628_v59 }
 0x315 PF: > { %s27_s11 = sadd.s32 1, %s2243_s11   ;;  %s2666_s1 = smov %s2239_s10 }
 0x316   : > { %p24_p3 = scmp.ge.s32.totalorder %s27_s11, 4   ;;  %s2667_s10 = smov %s2669_s12 }
 0x318   :  { %26 = sbr.rel (!%p24_p3) target bundleno = 27 (0x1b), region = 86 }

</bundles_post_ra>
